<compile_context>
chip_gen: v7x
topology: tpu7x:2x2x1
jax: 0.10.0
libtpu: 0.0.40
codegen_flags: <defaults>
</compile_context>

<pallas_src>
import jax
import jax.numpy as jnp
from jax.experimental import pallas as pl
from jax.experimental.pallas import tpu as pltpu


def _interp_matrix(in_size: int, out_size: int) -> jnp.ndarray:
    """PyTorch-style (align_corners=False) bilinear interpolation matrix.

    Returns W with shape (out_size, in_size) such that y = W @ x resamples a
    length-in_size signal to length out_size.
    """
    scale = in_size / out_size
    dst = jnp.arange(out_size, dtype=jnp.float32)
    src = (dst + 0.5) * scale - 0.5
    src = jnp.maximum(src, 0.0)                        # PyTorch clamps negatives to 0
    i0 = jnp.minimum(jnp.floor(src).astype(jnp.int32), in_size - 1)
    i1 = jnp.minimum(i0 + 1, in_size - 1)              # clamp upper neighbor
    lam = src - i0.astype(jnp.float32)
    rows = jnp.arange(out_size)
    W = jnp.zeros((out_size, in_size), jnp.float32)
    W = W.at[rows, i0].add(1.0 - lam)
    W = W.at[rows, i1].add(lam)
    return W


def _interp_kernel(x_ref, wh_ref, ww_ref, o_ref):
    # x_ref : (B, H_in, W_in)     batch-block of image planes
    # wh_ref: (H_out, H_in)       row-interpolation matrix
    # ww_ref: (W_in, W_pad)       column-interpolation matrix (transposed, lane-padded)
    # o_ref : (B, H_out, W_pad)
    B, H_in, W_in = x_ref.shape
    H_out = wh_ref.shape[0]
    W_pad = ww_ref.shape[1]
    cdt = ww_ref.dtype                                  # MXU operand dtype (f32 or bf16)

    # Width pass: one fused matmul over all B planes.
    x2d = x_ref[...].reshape(B * H_in, W_in).astype(cdt)
    xw = jnp.dot(x2d, ww_ref[...], preferred_element_type=jnp.float32)   # (B*H_in, W_pad)
    xw = xw.reshape(B, H_in, W_pad).astype(cdt)

    # Height pass: batched matmul over B (batch dim first in both operands).
    whb = jnp.broadcast_to(wh_ref[...][None, :, :], (B, H_out, H_in))
    out = jnp.einsum('bhi,biw->bhw', whb, xw,
                     preferred_element_type=jnp.float32)                 # (B, H_out, W_pad)
    o_ref[...] = out.astype(o_ref.dtype)


def interp(x: jnp.ndarray, size) -> jnp.ndarray:
    """Pallas equivalent of F.interpolate(x, size, mode='bilinear', align_corners=False).

    x: (N, C, H_in, W_in) -> (N, C, H_out, W_out)
    """
    N, C, H_in, W_in = x.shape
    H_out, W_out = size
    NC = N * C

    # Feed bf16 operands to the MXU when the input is bf16; otherwise stay f32.
    compute_dtype = jnp.bfloat16 if x.dtype == jnp.bfloat16 else jnp.float32

    # Lane-dense output width (multiple of 128). Zero-padded columns of W_w are
    # free MXU work and are sliced off in the wrapper.
    W_pad = max(128, ((W_out + 127) // 128) * 128)

    wh = _interp_matrix(H_in, H_out).astype(compute_dtype)          # (H_out, H_in)
    ww_core = _interp_matrix(W_in, W_out).T                         # (W_in, W_out)
    ww = (jnp.zeros((W_in, W_pad), jnp.float32)
          .at[:, :W_out].set(ww_core)
          .astype(compute_dtype))                                   # (W_in, W_pad)

    x_flat = x.reshape(NC, H_in, W_in)

    # Pick the batch-block B of planes per grid step:
    #   - keep (in + out + f32 intermediate), double-buffered, inside a modest
    #     VMEM budget (safe even on v7x's 64 MiB VMEM)
    #   - keep >= 2 grid steps so v7x's two TensorCores both get work.
    bytes_per = x.dtype.itemsize
    per_plane = (H_in * W_in * bytes_per          # input block
                 + H_out * W_pad * bytes_per      # output block
                 + H_in * W_pad * 4)              # f32 intermediate
    vmem_budget = 8 * 1024 * 1024
    B = max(1, min(NC, vmem_budget // (2 * per_plane)))
    if NC >= 2:
        B = min(B, pl.cdiv(NC, 2))
    num_blocks = pl.cdiv(NC, B)
    NC_pad = num_blocks * B
    if NC_pad != NC:
        x_flat = jnp.pad(x_flat, ((0, NC_pad - NC), (0, 0), (0, 0)))

    flops = 2 * NC_pad * (H_in * W_in * W_pad + H_out * H_in * W_pad)
    bytes_accessed = (NC_pad * H_in * W_in * bytes_per
                      + NC_pad * H_out * W_pad * bytes_per
                      + int(wh.size) * wh.dtype.itemsize
                      + int(ww.size) * ww.dtype.itemsize)

    out_flat = pl.pallas_call(
        _interp_kernel,
        out_shape=jax.ShapeDtypeStruct((NC_pad, H_out, W_pad), x.dtype),
        grid_spec=pltpu.PrefetchScalarGridSpec(
            num_scalar_prefetch=0,
            grid=(num_blocks,),
            in_specs=[
                pl.BlockSpec((B, H_in, W_in), lambda b: (b, 0, 0)),
                pl.BlockSpec((H_out, H_in), lambda b: (0, 0)),
                pl.BlockSpec((W_in, W_pad), lambda b: (0, 0)),
            ],
            out_specs=pl.BlockSpec((B, H_out, W_pad), lambda b: (b, 0, 0)),
        ),
        compiler_params=pltpu.CompilerParams(
            dimension_semantics=("parallel",),
            vmem_limit_bytes=32 * 1024 * 1024,
        ),
        cost_estimate=pl.CostEstimate(
            flops=flops, transcendentals=0, bytes_accessed=bytes_accessed),
    )(x_flat, wh, ww)

    # TODO(synk): very large planes (e.g. 4K f32) would need an additional
    # spatial tiling (K-axis grid + accumulator) instead of whole-plane blocks.
    return out_flat[:NC, :, :W_out].reshape(N, C, H_out, W_out)


def _reference_bilinear(x, size):
    """Pure-JAX gather-based reference (PyTorch align_corners=False semantics)."""
    N, C, H_in, W_in = x.shape
    H_out, W_out = size

    def coords(in_size, out_size):
        scale = in_size / out_size
        src = (jnp.arange(out_size, dtype=jnp.float32) + 0.5) * scale - 0.5
        src = jnp.maximum(src, 0.0)
        i0 = jnp.minimum(jnp.floor(src).astype(jnp.int32), in_size - 1)
        i1 = jnp.minimum(i0 + 1, in_size - 1)
        lam = src - i0.astype(jnp.float32)
        return i0, i1, lam

    h0, h1, lh = coords(H_in, H_out)
    w0, w1, lw = coords(W_in, W_out)
    xf = x.astype(jnp.float32)
    top = xf[:, :, h0, :][:, :, :, w0] * (1 - lw) + xf[:, :, h0, :][:, :, :, w1] * lw
    bot = xf[:, :, h1, :][:, :, :, w0] * (1 - lw) + xf[:, :, h1, :][:, :, :, w1] * lw
    out = top * (1 - lh[:, None]) + bot * lh[:, None]
    return out.astype(x.dtype)


if __name__ == "__main__":
    key = jax.random.PRNGKey(0)
    N, C, H_in, W_in = 2, 4, 16, 16
    size = (24, 20)  # target (H_out, W_out)

    x = jax.random.normal(key, (N, C, H_in, W_in), dtype=jnp.float32)

    out = interp(x, size)
    out = jax.block_until_ready(out)

    ref = _reference_bilinear(x, size)
    assert out.shape == (N, C, size[0], size[1])
    assert jnp.allclose(out, ref, atol=1e-5, rtol=1e-5), \
        float(jnp.max(jnp.abs(out.astype(jnp.float32) - ref.astype(jnp.float32))))

    print("KERNEL_OK")
</pallas_src>

<mosaic_0001>
module attributes {stable_mosaic.version = 11 : i64} {
  func.func @_interp_kernel(%arg0: i32, %arg1: memref<4x16x16xf32, #tpu.memory_space<vmem>>, %arg2: memref<24x16xf32, #tpu.memory_space<vmem>>, %arg3: memref<16x128xf32, #tpu.memory_space<vmem>>, %arg4: memref<4x24x128xf32, #tpu.memory_space<vmem>>) attributes {dimension_semantics = [#tpu.dimension_semantics<parallel>], iteration_bounds = array<i64: 2>, scalar_prefetch = 0 : i64, scratch_operands = 0 : i64, tpu.core_type = #tpu.core_type<tc>, window_params = [{transform_indices = @transform_0, window_bounds = array<i64: 4, 16, 16>}, {pipeline_mode = #tpu.pipeline_mode<synchronous>, transform_indices = @transform_1, window_bounds = array<i64: 24, 16>}, {pipeline_mode = #tpu.pipeline_mode<synchronous>, transform_indices = @transform_2, window_bounds = array<i64: 16, 128>}, {transform_indices = @transform_3, window_bounds = array<i64: 4, 24, 128>}]} {
    %c0 = arith.constant 0 : index
    %c0_0 = arith.constant 0 : index
    %c0_1 = arith.constant 0 : index
    %0 = vector.load %arg1[%c0, %c0_0, %c0_1] : memref<4x16x16xf32, #tpu.memory_space<vmem>>, vector<4x16x16xf32>
    %1 = vector.shape_cast %0 : vector<4x16x16xf32> to vector<64x16xf32>
    %c0_2 = arith.constant 0 : index
    %c0_3 = arith.constant 0 : index
    %2 = vector.load %arg3[%c0_2, %c0_3] : memref<16x128xf32, #tpu.memory_space<vmem>>, vector<16x128xf32>
    %cst = arith.constant dense<0.000000e+00> : vector<64x128xf32>
    %3 = tpu.matmul %1, %2, %cst {dimension_numbers = #tpu.dot_dimension_numbers<[1], [0], [0], [1], [0, 0, 1, 1], [], []>} : vector<64x16xf32>, vector<16x128xf32>, vector<64x128xf32> -> vector<64x128xf32>
    %4 = vector.shape_cast %3 : vector<64x128xf32> to vector<4x16x128xf32>
    %c0_4 = arith.constant 0 : index
    %c0_5 = arith.constant 0 : index
    %5 = vector.load %arg2[%c0_4, %c0_5] : memref<24x16xf32, #tpu.memory_space<vmem>>, vector<24x16xf32>
    %6 = vector.shape_cast %5 : vector<24x16xf32> to vector<1x24x16xf32>
    %7 = vector.shape_cast %6 : vector<1x24x16xf32> to vector<1x24x16xf32>
    %8 = vector.broadcast %7 : vector<1x24x16xf32> to vector<4x24x16xf32>
    "tpu.trace_start"() <{level = 10 : i32, message = "bhi,biw->bhw"}> : () -> ()
    %cst_6 = arith.constant dense<0.000000e+00> : vector<4x24x128xf32>
    %9 = tpu.matmul %8, %4, %cst_6 {dimension_numbers = #tpu.dot_dimension_numbers<[2], [1], [1], [2], [0, 0, 0, 1, 1, 2], [0], [0]>} : vector<4x24x16xf32>, vector<4x16x128xf32>, vector<4x24x128xf32> -> vector<4x24x128xf32>
    "tpu.trace_stop"() : () -> ()
    %c0_7 = arith.constant 0 : index
    %c0_8 = arith.constant 0 : index
    %c0_9 = arith.constant 0 : index
    %10 = vector.load %arg4[%c0_7, %c0_8, %c0_9] : memref<4x24x128xf32, #tpu.memory_space<vmem>>, vector<4x24x128xf32>
    tpu.vector_store %arg4[%c0_7, %c0_8, %c0_9], %9 {strides = array<i32>} : memref<4x24x128xf32, #tpu.memory_space<vmem>>, vector<4x24x128xf32>,
    return
  }
  func.func @transform_0(%arg0: i32) -> (i32, i32, i32) {
    %c0_i32 = arith.constant 0 : i32
    %c0_i32_0 = arith.constant 0 : i32
    %c0_i32_1 = arith.constant 0 : i32
    return %arg0, %c0_i32, %c0_i32_0 : i32, i32, i32
  }
  func.func @transform_1(%arg0: i32) -> (i32, i32) {
    %c0_i32 = arith.constant 0 : i32
    %c0_i32_0 = arith.constant 0 : i32
    %c0_i32_1 = arith.constant 0 : i32
    return %c0_i32, %c0_i32_0 : i32, i32
  }
  func.func @transform_2(%arg0: i32) -> (i32, i32) {
    %c0_i32 = arith.constant 0 : i32
    %c0_i32_0 = arith.constant 0 : i32
    %c0_i32_1 = arith.constant 0 : i32
    return %c0_i32, %c0_i32_0 : i32, i32
  }
  func.func @transform_3(%arg0: i32) -> (i32, i32, i32) {
    %c0_i32 = arith.constant 0 : i32
    %c0_i32_0 = arith.constant 0 : i32
    %c0_i32_1 = arith.constant 0 : i32
    return %arg0, %c0_i32, %c0_i32_0 : i32, i32, i32
  }
}

</mosaic_0001>

<bundles_post_ra>
// kernel: tpu_custom_call.1
= control target key start
LH: loop header
LB: loop body
LE: loop exit
PB: predicated region body
PF: predicated region fallthrough
CT: control target
= control target key end

     0   :  { %8 = vsyncpa [#allocation3], 0  ;;  %s1323_s0 = inlined_call_operand.hbm [shape: f32[8,16,16], index: 0, kind: input, shape index: {}]   ;;  %s1324_s1 = inlined_call_operand.vmem [shape: f32[24,16], index: 1, kind: input, shape index: {}]   ;;  %s1325_s2 = inlined_call_operand.vmem [shape: f32[16,128], index: 2, kind: input, shape index: {}]   ;;  %s1326_s3 = inlined_call_operand.hbm [shape: f32[8,24,128], index: 3, kind: output, shape index: {}]  }
   0x1   :  { %10 = vsyncpa [#allocation3 + $0x1], 0 }
   0x2   :  { %11 = vsyncpa [#allocation4], 0 }
   0x3   :  { %13 = vsyncpa [#allocation4 + $0x1], 0  ;;  %s1098_s12 = smov 0   ;;  %s1100_s13 = smov 0  }
   0x4   :  { %s1102_s14 = smov 0   ;;  %s1104_s15 = smov 0  }
   0x5 LB: > { %s1119_s16 = sadd.s32 4294967295, %s1067_s15   ;;  %s764_s17 = sadd.s32 4294967294, %s1067_s15   ;;  %s1067_s15 = sphi %s1104_s15, %s1339_s15   ;;  %s1063_s14 = sphi %s1102_s14, %s1338_s14   ;;  %s1059_s13 = sphi %s1100_s13, %s1337_s13   ;;  %s1055_s12 = sphi %s1098_s12, %s1336_s12  }
   0x6   : > { %s1123_s18 = sadd.s32 1, %s1067_s15   ;;  %s26_s19 = sadd.s32 1, %s1063_s14 }
   0x7   : > { %s23_s20 = ssub.s32 %s1067_s15, %s1123_s18  ;;  %p33_p0 = scmp.ne.s32.totalorder %s1063_s14, %s1059_s13 }
   0x8   : > { %p24_p1 = scmp.eq.s32.totalorder %s23_s20, 0  ;;  %p34_p2 = scmp.eq.s32.totalorder %s1067_s15, 0 }
   0x9   : > { %p39_p3 = scmp.ne.s32.totalorder %s1059_s13, %s1055_s12  ;;  %p40_p4 = scmp.eq.s32.totalorder %s1119_s16, 0 }
   0xa   : > { %s1135_s21 = scalar_select %p24_p1, %s1063_s14, %s26_s19  }
   0xb   : > { %p1137_p5 = por %p34_p2, %p33_p0  ;;  %p1141_p6 = por %p40_p4, %p39_p3 }
   0xc   : > { %p105_p7 = scmp.eq.s32.totalorder %s1119_s16, 1  ;;  %p111_p8 = scmp.eq.s32.totalorder %s764_s17, 1 }
   0xd   : > { %p930_p10 = scmp.lt.s32.totalorder %s1067_s15, 2  ;;  %s137_s26 = sand.u32 1, %s1063_s14  }
   0xe   : > { %p1148_p11 = por %p105_p7, %p33_p0  ;;  %p1152_p12 = por %p111_p8, %p39_p3 }
   0xf   : > { %s799_s27 = sshll.u32 %s1067_s15, 10  ;;  %s767_s28 = sshll.u32 %s137_s26, 6 }
  0x10   : > { %s1330_s24 = scalar_select %p1148_p11, 1, 0 }
  0x11   : > { %s1331_s25 = scalar_select %p1152_p12, 1, 0 }
  0x12   : > { %s1161_s4 = scalar_lea.hbm %s1323_s0, %s799_s27  ;;  %s141_s5 = scalar_lea.vmem [#allocation2], %s767_s28 }
  0x13   : > { %s149_s6 = sshll.u32 %s141_s5, 4  ;;  %p1165_p13 = pnand %p930_p10, %p1137_p5  ;;  %s1169_s6 = int_to_ptr.vmem [resolvable:$true] %s149_s6 }
  0x14   : > { %s1171_s8 = scalar_lea.sflag [#allocation3], %s137_s26  ;;  %s971_s9 = scalar_lea.hbm %s1161_s4, 1024 }
  0x15   : > { %p972_p0 = scmp.ne.s32.totalorder %s1161_s4, %s971_s9  ;;  %p973_p1 = pneg %p1165_p13 }
  0x16   : > { %s976_s17 = scalar_lea.hbm %s1323_s0, 2048  ;;  %p977_p4 = scmp.lt.u32.totalorder %s1161_s4, %s1323_s0 }
  0x17   : > { %p974_p2 = pnand %p973_p1, %p972_p0  ;;  %p978_p5 = scmp.lt.u32.totalorder %s976_s17, %s971_s9 }
  0x18   : > { %p980_p8 = scmp.lt.u32.totalorder %s971_s9, %s1161_s4 }
  0x19   : > { %p975_p3 = pneg %p974_p2  ;;  %p979_p7 = por %p978_p5, %p977_p4 }
  0x1b   : > { %p981_p10 = por %p980_p8, %p979_p7 }
  0x1d   : > { %p982_p9 = pnand %p981_p10, %p975_p3 }
  0x1f   : > { %985 = shalt.err (!%p982_p9)
}
  0x20   : > { %s986_s22 = scalar_lea.vmem %s1169_s6, 1024  ;;  %s1069_s26 = smov [#allocation2]  }
  0x21   : > { %p987_p0 = scmp.ne.s32.totalorder %s1169_s6, %s986_s22  ;;  %s991_s27 = sshll.u32 %s1069_s26, 4  ;;  %s992_s27 = int_to_ptr.vmem [resolvable:$false] %s991_s27 }
  0x22   : > { %s993_s28 = scalar_lea.vmem %s992_s27, 2048  ;;  %p994_p11 = scmp.lt.s32.totalorder %s1169_s6, %s992_s27 }
  0x23   : > { %p989_p2 = pnand %p987_p0, %p973_p1  ;;  %p995_p4 = scmp.lt.s32.totalorder %s993_s28, %s986_s22 }
  0x25   : > { %p990_p12 = pneg %p989_p2  ;;  %p996_p5 = por %p995_p4, %p994_p11 }
  0x27   : > { %p997_p7 = pnand %p996_p5, %p990_p12 }
  0x29   : > { %1000 = shalt.err (!%p997_p7)
}
  0x2a   : > { %s1070_s29 = smov 128   ;;  %s1071_s30 = smov 8  }
  0x2b   : > { %925 = dma.hbm_to_vmem [thread:$0]  (!%p1165_p13), %s1161_s4, 1024, %s1169_s6, %s1171_s8, %s1070_s29, %s1070_s29, %s1071_s30  }
  0x2c   : > { %p771_p9 = scmp.ge.s32.totalorder %s1067_s15, 1  ;;  %p157_p1 = scmp.lt.s32.totalorder %s1067_s15, 3 }
  0x2e   : > { %p158_p3 = pnand %p771_p9, %p157_p1 }
  0x2f   : > { %s1202_s5 = sand.u32 (!%p158_p3), 1, %s1059_s13  }
  0x30   : > { %161 = sbr.rel (%p158_p3) target bundleno = 536 (0x218), region = 32  ;;  %s772_s9 = sshll.u32 (!%p158_p3), %s1202_s5, 6 }
  0x31   : > { %s164_s10 = scalar_lea.sflag (!%p158_p3), [#allocation3], %s1202_s5  ;;  %s167_s11 = scalar_lea.vmem (!%p158_p3), [#allocation2], %s772_s9 }
  0x37   : > { %1046 = dma.done.wait (%p1141_p6), %s164_s10, 1024  }
  0x38   : > { %1048 = vsyncadd (%p1141_p6), %s164_s10, 4294966272  ;;  %vm202_vm0 = vcmask 130048   ;;  %v200_v0 = vld [vmem:[%s1325_s2] sm:$0xff]  ;;  %v201_v1 = vld [vmem:[%s1325_s2 + $0x8] sm:$0xff]  ;;  %v1072_v11 = vmov 0.0|0.0   ;;  %vm1073_vm1 = vmmov 0  }
  0x39   : > { %v192_v2 = vld [vmem:[%s167_s11] sm:$0xff]  ;;  %v898_v3 = vpack.c.bf16 %v201_v1, %v200_v0  ;;  %v193_v4 = vld [vmem:[%s167_s11 + $0x8] sm:$0xff]  ;;  %v194_v5 = vld [vmem:[%s167_s11 + $0x10] sm:$0xff]  ;;  %914 = vmatprep.subr.bf16.mxu1 %v1072_v11  ;;  %v1074_v12 = vmov 0.0   ;;  %s916_s27 = smul.u32 96, %s1202_s5  ;;  %s677_s4 = scalar_lea.sflag [#allocation4], %s1202_s5 }
  0x3a   : > { %834 = vmatprep.mubr.msk.f32.mxu0 %vm202_vm0, %v192_v2  ;;  %v195_v6 = vld [vmem:[%s167_s11 + $0x18] sm:$0xff]  ;;  %v196_v7 = vld [vmem:[%s167_s11 + $0x20] sm:$0xff]  ;;  %v197_v8 = vld [vmem:[%s167_s11 + $0x28] sm:$0xff]  ;;  %853 = vmatprep.mubr.msk.f32.mxu1 %vm1073_vm1, %v1074_v12  ;;  %s917_s29 = smul.u32 1536, %s1119_s16  ;;  %p1333_p11 = scmp.ne.s32.totalorder %s1330_s24, 0 }
  0x3b   : > { %899 = vmatprep.subr.bf16.mxu0 %v898_v3  ;;  %v198_v9 = vld [vmem:[%s167_s11 + $0x30] sm:$0xff]  ;;  %v199_v10 = vld [vmem:[%s167_s11 + $0x38] sm:$0xff]  ;;  %v333_v17 = vld [vmem:[%s1324_s1 + $0x8] sm:$0xff]  ;;  %s1258_s28 = scalar_lea.vmem [#allocation5], %s916_s27  ;;  %s1075_s16 = smov [#allocation5]  }
  0x3c   : > { %901 = vmatpush3.bf16.msra.mxu0 %v898_v3  ;;  %v332_v20 = vld [vmem:[%s1324_s1] sm:$0xff]  ;;  %v334_v22 = vld [vmem:[%s1324_s1 + $0x10] sm:$0xff]  ;;  %s691_s30 = sshll.u32 %s1258_s28, 4  ;;  %s1276_s11 = scalar_lea.hbm %s1326_s3, %s917_s29  ;;  %s1278_s30 = int_to_ptr.vmem [resolvable:$true] %s691_s30 }
  0x3d   : > { %902 = vmatprep.subr.bf16.mxu0 %v1072_v11  ;;  %s1001_s6 = scalar_lea.vmem %s1278_s30, 1536  ;;  %s1005_s7 = sshll.u32 %s1075_s16, 4  ;;  %s1006_s7 = int_to_ptr.vmem [resolvable:$false] %s1005_s7 }
  0x3e   : > { %p1002_p6 = scmp.ne.s32.totalorder %s1278_s30, %s1001_s6  ;;  %s1007_s8 = scalar_lea.vmem %s1006_s7, 3072 }
  0x3f   : > { %835 = vmatmul.mubr.msk.f32.vlgmr.msra.gmra.mrb[0].mxu0 %vm202_vm0, %v193_v4  ;;  %p1008_p8 = scmp.lt.s32.totalorder %s1278_s30, %s1006_s7  ;;  %p1009_p10 = scmp.lt.s32.totalorder %s1007_s8, %s1001_s6 }
  0x40   : > { %837 = vmatprep.mubr.msk.f32.mxu0 %vm202_vm0, %v194_v5  ;;  %p1003_p12 = pnand %p1002_p6, %p1333_p11 }
  0x41   : > { %p1010_p0 = por %p1009_p10, %p1008_p8 }
  0x42   : > { %p1004_p13 = pneg %p1003_p12 }
  0x43   : > { %838 = vmatmul.mubr.msk.f32.gmra.mrb[2].mxu0 %vm202_vm0, %v195_v6 }
  0x44   : > { %840 = vmatprep.mubr.msk.f32.mxu0 %vm202_vm0, %v196_v7  ;;  %p1011_p2 = pnand %p1010_p0, %p1004_p13 }
  0x47   : > { %841 = vmatmul.mubr.msk.f32.gmra.mrb[4].mxu0 %vm202_vm0, %v197_v8 }
  0x48   : > { %843 = vmatprep.mubr.msk.f32.mxu0 %vm202_vm0, %v198_v9 }
  0x4b   : > { %844 = vmatmul.mubr.msk.f32.gmra.mrb[6].mxu0 %vm202_vm0, %v199_v10 }
  0x4c   : > { %850 = vmatprep.mubr.msk.f32.mxu0 %vm1073_vm1, %v1074_v12 }
 0x112   : > { %v836_v13 = vpop.f32.mrb[0].mxu0 }
 0x113   : > { %v293_v14 = vpop.f32.mrb[1].mxu0 }
 0x114   : > { %v903_v15 = vpack.c.bf16 %v836_v13, %v293_v14 }
 0x116   : > { %v839_v16 = vpop.f32.mrb[2].mxu0  ;;  %904 = vmatpush3.bf16.msra.mxu0 %v903_v15  ;;  %915 = vmatpush3.bf16.msra.mxu1 %v903_v15 }
 0x117   : > { %v303_v18 = vpop.f32.mrb[3].mxu0  ;;  %905 = vmatprep.subr.bf16.mxu1 %v1072_v11  ;;  %908 = vmatprep.subr.bf16.mxu0 %v1072_v11 }
 0x118   : > { %v906_v19 = vpack.c.bf16 %v839_v16, %v303_v18 }
 0x119   : > { %854 = vmatmul.mubr.msk.f32.vlgmr.msra.gmra.mrb[0].mxu1 %vm202_vm0, %v333_v17  ;;  %851 = vmatmul.mubr.msk.f32.vlgmr.msra.gmra.mrb[8].mxu0 %vm202_vm0, %v332_v20 }
 0x11a   : > { %v842_v21 = vpop.f32.mrb[4].mxu0  ;;  %907 = vmatpush3.bf16.msra.mxu1 %v906_v19  ;;  %856 = vmatprep.mubr.msk.f32.mxu1 %vm1073_vm1, %v1074_v12 }
 0x11b   : > { %v313_v23 = vpop.f32.mrb[5].mxu0  ;;  %911 = vmatprep.subr.bf16.mxu1 %v1072_v11  ;;  %876 = vmatprep.mubr.msk.f32.mxu0 %vm1073_vm1, %v1074_v12 }
 0x11c   : > { %v909_v24 = vpack.c.bf16 %v842_v21, %v313_v23 }
 0x11d   : > { %857 = vmatmul.mubr.msk.f32.gmra.mrb[2].mxu1 %vm202_vm0, %v334_v22 }
 0x11e   : > { %v845_v25 = vpop.f32.mrb[6].mxu0  ;;  %910 = vmatpush3.bf16.msra.mxu0 %v909_v24  ;;  %863 = vmatprep.mubr.msk.f32.mxu1 %vm1073_vm1, %v1074_v12 }
 0x11f   : > { %v323_v26 = vpop.f32.mrb[7].mxu0 }
 0x120   : > { %v912_v27 = vpack.c.bf16 %v845_v25, %v323_v26 }
 0x121   : > { %864 = vmatmul.mubr.msk.f32.vlgmr.msra.gmra.mrb[4].mxu1 %vm202_vm0, %v332_v20  ;;  %877 = vmatmul.mubr.msk.f32.vlgmr.msra.gmra.mrb[10].mxu0 %vm202_vm0, %v332_v20 }
 0x122   : > { %913 = vmatpush3.bf16.msra.mxu1 %v912_v27  ;;  %866 = vmatprep.mubr.msk.f32.mxu1 %vm1073_vm1, %v1074_v12 }
 0x123   : > { %879 = vmatprep.mubr.msk.f32.mxu0 %vm1073_vm1, %v1074_v12 }
 0x125   : > { %867 = vmatmul.mubr.msk.f32.gmra.mrb[6].mxu1 %vm202_vm0, %v333_v17  ;;  %880 = vmatmul.mubr.msk.f32.gmra.mrb[12].mxu0 %vm202_vm0, %v333_v17 }
 0x126   : > { %869 = vmatprep.mubr.msk.f32.mxu1 %vm1073_vm1, %v1074_v12  ;;  %882 = vmatprep.mubr.msk.f32.mxu0 %vm1073_vm1, %v1074_v12 }
 0x129   : > { %870 = vmatmul.mubr.msk.f32.gmra.mrb[8].mxu1 %vm202_vm0, %v334_v22  ;;  %883 = vmatmul.mubr.msk.f32.gmra.mrb[14].mxu0 %vm202_vm0, %v334_v22 }
 0x12a   : > { %889 = vmatprep.mubr.msk.f32.mxu1 %vm1073_vm1, %v1074_v12 }
 0x12d   : > { %890 = vmatmul.mubr.msk.f32.vlgmr.msra.gmra.mrb[10].mxu1 %vm202_vm0, %v332_v20 }
 0x12e   : > { %892 = vmatprep.mubr.msk.f32.mxu1 %vm1073_vm1, %v1074_v12 }
 0x131   : > { %893 = vmatmul.mubr.msk.f32.gmra.mrb[12].mxu1 %vm202_vm0, %v333_v17 }
 0x132   : > { %895 = vmatprep.mubr.msk.f32.mxu1 %vm1073_vm1, %v1074_v12 }
 0x135   : > { %896 = vmatmul.mubr.msk.f32.gmra.mrb[14].mxu1 %vm202_vm0, %v334_v22 }
 0x1ec   : > { %v415_v28 = vpop.f32.mrb[0].mxu1  ;;  %v410_v29 = vpop.f32.mrb[8].mxu0 }
 0x1ed   : > { %665 = vst [vmem:[%s1258_s28 + $0x8] sm:$0xff] %v415_v28  ;;  %v855_v30 = vpop.f32.mrb[1].mxu1  ;;  %664 = vst [vmem:[%s1258_s28] sm:$0xff] %v410_v29  ;;  %v852_v31 = vpop.f32.mrb[9].mxu0 }
 0x1f0   : > { %v420_v32 = vpop.f32.mrb[2].mxu1 }
 0x1f1   : > { %666 = vst [vmem:[%s1258_s28 + $0x10] sm:$0xff] %v420_v32  ;;  %v858_v33 = vpop.f32.mrb[3].mxu1 }
 0x1f4   : > { %v490_v34 = vpop.f32.mrb[4].mxu1  ;;  %v570_v35 = vpop.f32.mrb[10].mxu0 }
 0x1f5   : > { %667 = vst [vmem:[%s1258_s28 + $0x18] sm:$0xff] %v490_v34  ;;  %v865_v36 = vpop.f32.mrb[5].mxu1  ;;  %670 = vst [vmem:[%s1258_s28 + $0x30] sm:$0xff] %v570_v35  ;;  %v878_v37 = vpop.f32.mrb[11].mxu0 }
 0x1f8   : > { %v495_v38 = vpop.f32.mrb[6].mxu1  ;;  %v575_v39 = vpop.f32.mrb[12].mxu0 }
 0x1f9   : > { %668 = vst [vmem:[%s1258_s28 + $0x20] sm:$0xff] %v495_v38  ;;  %v868_v40 = vpop.f32.mrb[7].mxu1  ;;  %671 = vst [vmem:[%s1258_s28 + $0x38] sm:$0xff] %v575_v39  ;;  %v881_v41 = vpop.f32.mrb[13].mxu0 }
 0x1fc   : > { %v500_v42 = vpop.f32.mrb[8].mxu1  ;;  %v580_v43 = vpop.f32.mrb[14].mxu0 }
 0x1fd   : > { %669 = vst [vmem:[%s1258_s28 + $0x28] sm:$0xff] %v500_v42  ;;  %v871_v44 = vpop.f32.mrb[9].mxu1  ;;  %672 = vst [vmem:[%s1258_s28 + $0x40] sm:$0xff] %v580_v43  ;;  %v884_v45 = vpop.f32.mrb[15].mxu0 }
 0x200   : > { %v650_v46 = vpop.f32.mrb[10].mxu1 }
 0x201   : > { %673 = vst [vmem:[%s1258_s28 + $0x48] sm:$0xff] %v650_v46  ;;  %v891_v47 = vpop.f32.mrb[11].mxu1 }
 0x204   : > { %v655_v48 = vpop.f32.mrb[12].mxu1 }
 0x205   : > { %674 = vst [vmem:[%s1258_s28 + $0x50] sm:$0xff] %v655_v48  ;;  %v894_v49 = vpop.f32.mrb[13].mxu1 }
 0x208   : > { %v660_v50 = vpop.f32.mrb[14].mxu1 }
 0x209   : > { %675 = vst [vmem:[%s1258_s28 + $0x58] sm:$0xff] %v660_v50  ;;  %v897_v51 = vpop.f32.mrb[15].mxu1 }
 0x20a   : > { %1014 = shalt.err (!%p1011_p2)
}
 0x20b   : > { %s1015_s23 = scalar_lea.hbm %s1276_s11, 1536  ;;  %s1019_s20 = scalar_lea.hbm %s1326_s3, 3072 }
 0x20c   : > { %p1016_p4 = scmp.ne.s32.totalorder %s1276_s11, %s1015_s23  ;;  %p1020_p9 = scmp.lt.u32.totalorder %s1276_s11, %s1326_s3 }
 0x20d   : > { %p1021_p1 = scmp.lt.u32.totalorder %s1019_s20, %s1015_s23  ;;  %p1023_p6 = scmp.lt.u32.totalorder %s1015_s23, %s1276_s11 }
 0x20e   : > { %p1017_p5 = pnand %p1016_p4, %p1333_p11 }
 0x20f   : > { %p1022_p3 = por %p1021_p1, %p1020_p9 }
 0x210   : > { %p1018_p7 = pneg %p1017_p5 }
 0x211   : > { %p1024_p12 = por %p1023_p6, %p1022_p3 }
 0x213   : > { %p1025_p13 = pnand %p1024_p12, %p1018_p7 }
 0x215   : > { %1028 = shalt.err (!%p1025_p13)
}
 0x216   : > { %s1076_s27 = smov 128   ;;  %s1077_s28 = smov 8  }
 0x217   : > { %920 = dma.vmem_to_hbm [thread:$0]  (%p1333_p11), %s1278_s30, 1536, %s1276_s11, %s677_s4, %s1076_s27, %s1076_s27, %s1077_s28  }
 0x218 PF: > { %s706_s29 = sand.u32 1, %s1055_s12   ;;  %p1334_p8 = scmp.ne.s32.totalorder %s1331_s25, 0 }
 0x219   : > { %p1335_p10 = scmp.ge.s32.totalorder %s1067_s15, 2  ;;  %s707_s9 = scalar_lea.sflag [#allocation4], %s706_s29 }
 0x21b   : > { %p927_p0 = pnand %p1335_p10, %p1334_p8 }
 0x21d   : > { %1050 = dma.done.wait (!%p927_p0), %s707_s9, 1536  }
 0x21e   : > { %1052 = vsyncadd (!%p927_p0), %s707_s9, 4294965760  ;;  %p16_p2 = scmp.ge.s32.totalorder %s1123_s18, 4   ;;  %s1336_s12 = smov %s1059_s13 }
 0x21f   : > { %s1337_s13 = smov %s1063_s14  ;;  %s1338_s14 = smov %s1135_s21 }
 0x220   : > { %s1339_s15 = smov %s1123_s18  ;;  %18 = sbr.rel (!%p16_p2) target bundleno = 5 (0x5), region = 77 }
 0x227   :  { %712 = vsyncpa [#allocation3], 1 }
 0x228   :  { %714 = vsyncpa [#allocation3 + $0x1], 1 }
 0x229   :  { %715 = vsyncpa [#allocation4], 1 }
 0x22a   :  { %717 = vsyncpa [#allocation4 + $0x1], 1 }

</bundles_post_ra>
